<compile_context>
chip_gen: v7x
topology: tpu7x:2x2x1
jax: 0.10.0
libtpu: 0.0.40
codegen_flags: <defaults>
</compile_context>

<pallas_src>
import functools
import math

import jax
import jax.numpy as jnp
from jax import lax
from jax.experimental import pallas as pl
from jax.experimental.pallas import tpu as pltpu

# ---- module hyper-parameters (from the PyTorch module) ----------------------
M_PLANES = 32
BLOCK_REPS = 2
N_PLANES = [M_PLANES * i for i in range(1, 8)]   # [32, 64, 96, 128, 160, 192, 224]
NUM_CLASSES = 20
BN_EPS = 1e-4                                    # scn BatchNormReLU default eps

# small synthetic problem size (real data.full_scale = 4096)
FULL_SCALE = 64                                  # 7 U-Net levels -> needs >= 2**6
N_POINTS = 256

TM = 128                        # row tile (MXU aligned); >=2 tiles -> both v7x cores
VMEM_LIMIT = 48 * 1024 * 1024   # explicit cap; fits v7x's 64 MiB VMEM, fine on v5e/v6e


def _round_up(x, m):
    return (x + m - 1) // m * m


# ========================= fused sparse-conv Pallas kernel ====================
# grid = (row_tiles, kernel_offsets); for each (i, k):
#   gathered = onehot(idx[k, i*TM:(i+1)*TM]) @ feats          (MXU gather, bf16)
#   acc     += gathered @ W[wsel[i, k]]                       (bf16 x bf16 -> f32)
# at k == last: out = [relu]( acc*scale + bias [+ residual] )

def _spconv_kernel(wsel_ref, idx_ref, feats_ref, w_ref, scale_ref, bias_ref,
                   *args, has_residual, has_relu):
    if has_residual:
        res_ref, o_ref, acc_ref = args
    else:
        o_ref, acc_ref = args
    i = pl.program_id(0)
    k = pl.program_id(1)

    @pl.when(k == 0)
    def _():
        acc_ref[...] = jnp.zeros_like(acc_ref)

    nf = feats_ref.shape[0]
    rows = idx_ref[...]                                             # (TM, 1) int32
    sites = lax.broadcasted_iota(jnp.int32, (rows.shape[0], nf), 1)
    sel = jnp.where(rows == sites, 1.0, 0.0).astype(jnp.bfloat16)   # one-hot gather
    gathered = jnp.dot(sel, feats_ref[...],
                       preferred_element_type=jnp.float32).astype(jnp.bfloat16)
    w_k = w_ref[wsel_ref[i, k]]                                     # (Cin, Cout) bf16
    acc_ref[...] += jnp.dot(gathered, w_k, preferred_element_type=jnp.float32)

    @pl.when(k == pl.num_programs(1) - 1)
    def _():
        y = acc_ref[...] * scale_ref[...] + bias_ref[...]           # fused BN / bias
        if has_residual:
            y = y + res_ref[...].astype(jnp.float32)                # fused residual add
        if has_relu:
            y = jnp.maximum(y, 0.0)                                 # fused ReLU
        o_ref[...] = y.astype(o_ref.dtype)


_CONV_CACHE = {}


def _get_conv_call(n_k, n_tiles, nf, cin, cout, n_w, has_res, relu, out_dtype):
    key = (n_k, n_tiles, nf, cin, cout, n_w, has_res, relu, out_dtype)
    fn = _CONV_CACHE.get(key)
    if fn is not None:
        return fn
    mp = n_tiles * TM
    kernel = functools.partial(_spconv_kernel, has_residual=has_res, has_relu=relu)
    in_specs = [
        pl.BlockSpec((TM, 1), lambda i, k, *_: (k * n_tiles + i, 0)),   # gather rows
        pl.BlockSpec((nf, cin), lambda i, k, *_: (0, 0)),               # feats (VMEM resident)
        pl.BlockSpec((n_w, cin, cout), lambda i, k, *_: (0, 0, 0)),     # weights (VMEM resident)
        pl.BlockSpec((1, cout), lambda i, k, *_: (0, 0)),               # epilogue scale
        pl.BlockSpec((1, cout), lambda i, k, *_: (0, 0)),               # epilogue bias
    ]
    if has_res:
        in_specs.append(pl.BlockSpec((TM, cout), lambda i, k, *_: (i, 0)))
    fn = jax.jit(pl.pallas_call(
        kernel,
        out_shape=jax.ShapeDtypeStruct((mp, cout), out_dtype),
        grid_spec=pltpu.PrefetchScalarGridSpec(
            num_scalar_prefetch=1,                     # per-tile weight-slice table
            grid=(n_tiles, n_k),                       # reduction (offsets) axis last
            in_specs=in_specs,
            out_specs=pl.BlockSpec((TM, cout), lambda i, k, *_: (i, 0)),
            scratch_shapes=[pltpu.VMEM((TM, cout), jnp.float32)],
        ),
        compiler_params=pltpu.CompilerParams(
            dimension_semantics=("parallel", "arbitrary"),
            vmem_limit_bytes=VMEM_LIMIT),
    ))
    _CONV_CACHE[key] = fn
    return fn


def fused_sparse_conv(feats, idx, weight, wsel=None, scale=None, bias=None,
                      residual=None, relu=False, out_dtype=jnp.bfloat16):
    """out[i] = epi(sum_k feats[idx[k, i]] @ weight[wsel[i//TM, k]]); idx == -1 gathers zeros."""
    n_k, n_rows = idx.shape
    nf, cin = feats.shape
    n_w, cin_w, cout = weight.shape
    assert cin_w == cin
    mp = _round_up(n_rows, TM)
    if mp != n_rows:
        idx = jnp.pad(idx, ((0, 0), (0, mp - n_rows)), constant_values=-1)
    n_tiles = mp // TM
    if wsel is None:
        wsel = jnp.tile(jnp.arange(n_k, dtype=jnp.int32), (n_tiles, 1))
    if scale is None:
        scale = jnp.ones((cout,), jnp.float32)
    if bias is None:
        bias = jnp.zeros((cout,), jnp.float32)
    args = [wsel.astype(jnp.int32),
            idx.reshape(n_k * mp, 1).astype(jnp.int32),
            feats.astype(jnp.bfloat16),
            weight.astype(jnp.bfloat16),
            scale.reshape(1, cout).astype(jnp.float32),
            bias.reshape(1, cout).astype(jnp.float32)]
    if residual is not None:
        res = residual.astype(jnp.bfloat16)
        if res.shape[0] != mp:
            res = jnp.pad(res, ((0, mp - res.shape[0]), (0, 0)))
        args.append(res)
    fn = _get_conv_call(n_k, n_tiles, nf, cin, cout, n_w,
                        residual is not None, relu, out_dtype)
    out = fn(*args)
    return out[:n_rows] if mp != n_rows else out


# ================= stand-alone (pre-activation) BatchNorm + ReLU ==============

def _bn_relu_kernel(x_ref, s_ref, b_ref, o_ref):
    x = x_ref[...].astype(jnp.float32)
    o_ref[...] = jnp.maximum(x * s_ref[...] + b_ref[...], 0.0).astype(o_ref.dtype)


_BN_CACHE = {}


def pallas_bn_relu(x, scale, bias):
    n, c = x.shape
    mp = _round_up(n, TM)
    xp = x if mp == n else jnp.pad(x, ((0, mp - n), (0, 0)))
    key = (mp, c, str(x.dtype))
    fn = _BN_CACHE.get(key)
    if fn is None:
        fn = jax.jit(pl.pallas_call(
            _bn_relu_kernel,
            out_shape=jax.ShapeDtypeStruct((mp, c), jnp.bfloat16),
            grid_spec=pltpu.PrefetchScalarGridSpec(
                num_scalar_prefetch=0,
                grid=(mp // TM,),
                in_specs=[pl.BlockSpec((TM, c), lambda i: (i, 0)),
                          pl.BlockSpec((1, c), lambda i: (0, 0)),
                          pl.BlockSpec((1, c), lambda i: (0, 0))],
                out_specs=pl.BlockSpec((TM, c), lambda i: (i, 0)),
            ),
            compiler_params=pltpu.CompilerParams(
                dimension_semantics=("parallel",),
                vmem_limit_bytes=VMEM_LIMIT),
        ))
        _BN_CACHE[key] = fn
    out = fn(xp, scale.reshape(1, c).astype(jnp.float32),
             bias.reshape(1, c).astype(jnp.float32))
    return out[:n] if mp != n else out


def _bn_scale_bias(C):
    # eval-mode BN: gamma=1, beta=0, running_mean=0, running_var=1
    # TODO(synk): train-mode BN would use batch statistics over active sites.
    scale = jnp.full((C,), 1.0 / math.sqrt(1.0 + BN_EPS), jnp.float32)
    bias = jnp.zeros((C,), jnp.float32)
    return scale, bias


def bn_relu(feats, C):
    scale, bias = _bn_scale_bias(C)
    return pallas_bn_relu(feats, scale, bias)


# ============================ parameters =====================================

class ParamGen:
    """Deterministic synthetic parameter initialization."""

    def __init__(self, seed=0):
        self.base = jax.random.PRNGKey(seed)
        self.count = 0

    def next(self, shape, fan_in):
        self.count += 1
        k = jax.random.fold_in(self.base, self.count)
        return (1.0 / math.sqrt(fan_in)) * jax.random.normal(k, shape, jnp.float32)


# ====================== sparse-voxel coordinate machinery ====================

OFFSETS3 = [(dz, dy, dx) for dz in (-1, 0, 1) for dy in (-1, 0, 1) for dx in (-1, 0, 1)]
OFFSETS2 = [(dz, dy, dx) for dz in (0, 1) for dy in (0, 1) for dx in (0, 1)]


def make_levels(coords_sorted, spatial, num_levels):
    """Active-site hierarchy (coords, sorted keys, validity) per U-Net level."""
    N = coords_sorted.shape[0]
    levels = []
    S = spatial
    c = coords_sorted
    valid = jnp.ones((N,), bool)
    for lvl in range(num_levels):
        sent = S * S * S
        keys = jnp.where(valid, c[:, 0] * S * S + c[:, 1] * S + c[:, 2], sent)
        levels.append({'coords': c, 'keys': keys, 'valid': valid, 'S': S})
        if lvl + 1 < num_levels:
            Sc = S // 2
            csent = Sc * Sc * Sc
            ck = jnp.where(valid,
                           (c[:, 0] // 2) * Sc * Sc + (c[:, 1] // 2) * Sc + (c[:, 2] // 2),
                           csent)
            uk = jnp.unique(ck, size=N, fill_value=csent)
            valid = uk < csent
            nz = uk // (Sc * Sc)
            ny = (uk // Sc) % Sc
            nx = uk % Sc
            c = jnp.stack([nz, ny, nx], axis=1).astype(jnp.int32)
            S = Sc
    return levels


def lookup(table_keys, query_keys, query_valid):
    N = table_keys.shape[0]
    idx = jnp.searchsorted(table_keys, query_keys)
    idx_c = jnp.clip(idx, 0, N - 1)
    found = (table_keys[idx_c] == query_keys) & query_valid & (idx < N)
    return idx_c, found


def _submanifold_idx(level):
    """(27, N) gather-row table for the 3x3x3 submanifold rulebook (cached per level)."""
    if 'sm_idx' in level:
        return level['sm_idx']
    c, keys, valid, S = level['coords'], level['keys'], level['valid'], level['S']
    cols = []
    for off in OFFSETS3:
        nb = c + jnp.array(off, jnp.int32)
        in_range = jnp.all((nb >= 0) & (nb < S), axis=1) & valid
        nk = nb[:, 0] * S * S + nb[:, 1] * S + nb[:, 2]
        pos, found = lookup(keys, nk, in_range)
        cols.append(jnp.where(found, pos, -1))
    idx = jnp.stack(cols, axis=0).astype(jnp.int32)
    level['sm_idx'] = idx
    return idx


def submanifold_conv(level, feats, weight, scale=None, bias=None,
                     residual=None, relu=False):
    """scn.SubmanifoldConvolution kernel 3, no bias (epilogue optionally fused)."""
    return fused_sparse_conv(feats, _submanifold_idx(level), weight,
                             scale=scale, bias=bias, residual=residual, relu=relu)


def conv_down(fine_level, coarse_level, feats_fine, weight):
    """scn.Convolution filter 2 stride 2, no bias.  weight: (8, Cin, Cout)."""
    cc, cv = coarse_level['coords'], coarse_level['valid']
    fS, fkeys = fine_level['S'], fine_level['keys']
    cols = []
    for off in OFFSETS2:
        ch = cc * 2 + jnp.array(off, jnp.int32)
        ck = ch[:, 0] * fS * fS + ch[:, 1] * fS + ch[:, 2]
        pos, found = lookup(fkeys, ck, cv)
        cols.append(jnp.where(found, pos, -1))
    idx = jnp.stack(cols, axis=0).astype(jnp.int32)
    return fused_sparse_conv(feats_fine, idx, weight)


def deconv_up(coarse_level, fine_level, feats_coarse, weight):
    """scn.Deconvolution filter 2 stride 2, no bias.  weight: (8, Cin, Cout).

    Fine output rows are grouped by their child offset into TM-aligned slots so
    every tile multiplies exactly one (Cin, Cout) weight slice (selected through
    the scalar-prefetch wsel table): 1x FLOPs, no (N, 8, Cout) HBM intermediate.
    """
    fc, fv = fine_level['coords'], fine_level['valid']
    cS, ckeys = coarse_level['S'], coarse_level['keys']
    n = fc.shape[0]
    parent = fc // 2
    pk = parent[:, 0] * cS * cS + parent[:, 1] * cS + parent[:, 2]
    pos, found = lookup(ckeys, pk, fv)
    gidx = jnp.where(found, pos, -1).astype(jnp.int32)
    off = ((fc[:, 0] % 2) * 4 + (fc[:, 1] % 2) * 2 + (fc[:, 2] % 2)).astype(jnp.int32)

    counts = jnp.stack([jnp.sum(off == g) for g in range(8)]).astype(jnp.int32)
    padded = ((counts + TM - 1) // TM) * TM
    starts = jnp.concatenate([jnp.zeros((1,), jnp.int32), jnp.cumsum(padded)[:-1]])
    group_base = jnp.concatenate([jnp.zeros((1,), jnp.int32), jnp.cumsum(counts)[:-1]])

    order = jnp.argsort(off)
    off_sorted = off[order]
    pos_in_group = jnp.arange(n, dtype=jnp.int32) - group_base[off_sorted]
    slot_sorted = starts[off_sorted] + pos_in_group

    n_slots = _round_up(n, TM) + 8 * TM            # static bound on group-padded rows
    idx_slots = jnp.full((n_slots,), -1, jnp.int32).at[slot_sorted].set(gidx[order])
    slot_of_row = jnp.zeros((n,), jnp.int32).at[order].set(slot_sorted)

    n_tiles = n_slots // TM
    tile_group = jnp.clip(
        jnp.searchsorted(starts // TM, jnp.arange(n_tiles, dtype=jnp.int32),
                         side='right') - 1, 0, 7).astype(jnp.int32)
    wsel = tile_group.reshape(n_tiles, 1)

    out_slots = fused_sparse_conv(feats_coarse, idx_slots[None, :], weight, wsel=wsel)
    return out_slots[slot_of_row]                  # back to fine-site (sorted-key) order


def nin_conv(feats, weight):
    """scn.NetworkInNetwork (1x1), no bias."""
    n = feats.shape[0]
    idx = jnp.arange(n, dtype=jnp.int32)[None, :]
    return fused_sparse_conv(feats, idx, weight[None, :, :])


def linear_head(feats, row_order, weight, bias):
    """OutputLayer reorder fused into the classifier gather; Linear bias fused in epilogue."""
    idx = row_order.astype(jnp.int32)[None, :]
    return fused_sparse_conv(feats, idx, weight[None, :, :], bias=bias,
                             out_dtype=jnp.float32)


# =============================== network =====================================

def residual_block(level, feats, a, b, pg):
    """scn residual block: (Identity|NiN)  +  [BNReLU, SMConv, BNReLU, SMConv]."""
    if a == b:
        identity = feats
    else:
        w_nin = pg.next((a, b), a)                               # NetworkInNetwork, no bias
        identity = nin_conv(feats, w_nin)
    h = bn_relu(feats, a)                                        # pre-activation
    w1 = pg.next((27, a, b), 27 * a)
    s1, b1 = _bn_scale_bias(b)
    h = submanifold_conv(level, h, w1, scale=s1, bias=b1, relu=True)   # conv + fused BNReLU
    w2 = pg.next((27, b, b), 27 * b)
    return submanifold_conv(level, h, w2, residual=identity)          # conv + fused residual add


def unet(levels, lvl, feats, planes, pg):
    for _ in range(BLOCK_REPS):
        feats = residual_block(levels[lvl], feats, planes[0], planes[0], pg)
    if len(planes) > 1:
        skip = feats
        h = bn_relu(feats, planes[0])
        w_down = pg.next((8, planes[0], planes[1]), 8 * planes[0])
        h = conv_down(levels[lvl], levels[lvl + 1], h, w_down)
        h = unet(levels, lvl + 1, h, planes[1:], pg)
        h = bn_relu(h, planes[1])
        w_up = pg.next((8, planes[1], planes[0]), planes[1])
        h = deconv_up(levels[lvl + 1], levels[lvl], h, w_up)
        feats = jnp.concatenate([skip, h], axis=1)               # JoinTable
        for i in range(BLOCK_REPS):
            a = planes[0] * (2 if i == 0 else 1)
            feats = residual_block(levels[lvl], feats, a, planes[0], pg)
    return feats


def model_forward(coords, point_feats, pg):
    """Full Model.forward: sparseModel(x) -> Linear(m, 20)."""
    S = FULL_SCALE
    # InputLayer(dimension, full_scale, mode=4): voxelize points.
    # TODO(synk): mode=4 averaging of duplicate-coordinate points is not
    #   implemented; the synthetic input is built with unique voxel coords.
    keys0 = coords[:, 0] * S * S + coords[:, 1] * S + coords[:, 2]
    perm = jnp.argsort(keys0)
    inv_perm = jnp.argsort(perm)
    coords_s = coords[perm]
    feats = point_feats[perm].astype(jnp.bfloat16)

    levels = make_levels(coords_s, S, len(N_PLANES))

    # SubmanifoldConvolution(dimension, 3, m, 3, bias=False)
    w0 = pg.next((27, 3, M_PLANES), 27 * 3)
    feats = submanifold_conv(levels[0], feats, w0)

    # scn.UNet(dimension, block_reps, [m .. 7m], residual_blocks=True)
    feats = unet(levels, 0, feats, N_PLANES, pg)

    # BatchNormReLU(m)
    feats = bn_relu(feats, M_PLANES)

    # OutputLayer(dimension) reorder + nn.Linear(m, 20), fused into one kernel.
    w_lin = pg.next((M_PLANES, NUM_CLASSES), M_PLANES)
    b_lin = pg.next((NUM_CLASSES,), M_PLANES)
    return linear_head(feats, inv_perm, w_lin, b_lin)


# ================================= main ======================================

if __name__ == "__main__":
    key = jax.random.PRNGKey(0)
    kc, kf = jax.random.split(key)
    # N_POINTS unique voxel coordinates inside the [0, FULL_SCALE)^3 grid
    flat = jax.random.permutation(kc, FULL_SCALE ** 3)[:N_POINTS]
    coords = jnp.stack(
        [flat // (FULL_SCALE * FULL_SCALE),
         (flat // FULL_SCALE) % FULL_SCALE,
         flat % FULL_SCALE], axis=1).astype(jnp.int32)
    point_feats = jax.random.normal(kf, (N_POINTS, 3), dtype=jnp.float32)

    pg = ParamGen(0)
    out = model_forward(coords, point_feats, pg)
    out = jax.block_until_ready(out)
    assert out.shape == (N_POINTS, NUM_CLASSES) and out.dtype == jnp.float32
    print("KERNEL_OK")
</pallas_src>

<mosaic_0001>
module attributes {stable_mosaic.version = 11 : i64} {
  func.func @_spconv_kernel(%arg0: i32, %arg1: i32, %arg2: memref<2x27xi32, #tpu.memory_space<smem>>, %arg3: memref<128x1xi32, #tpu.memory_space<vmem>>, %arg4: memref<256x3xbf16, #tpu.memory_space<vmem>>, %arg5: memref<27x3x32xbf16, #tpu.memory_space<vmem>>, %arg6: memref<1x32xf32, #tpu.memory_space<vmem>>, %arg7: memref<1x32xf32, #tpu.memory_space<vmem>>, %arg8: memref<128x32xbf16, #tpu.memory_space<vmem>>, %arg9: memref<128x32xf32, #tpu.memory_space<vmem>>) attributes {dimension_semantics = [#tpu.dimension_semantics<parallel>, #tpu.dimension_semantics<arbitrary>], iteration_bounds = array<i64: 2, 27>, scalar_prefetch = 1 : i64, scratch_operands = 1 : i64, tpu.core_type = #tpu.core_type<tc>, window_params = [{transform_indices = @transform_0, window_bounds = array<i64: 128, 1>}, {pipeline_mode = #tpu.pipeline_mode<synchronous>, transform_indices = @transform_1, window_bounds = array<i64: 256, 3>}, {pipeline_mode = #tpu.pipeline_mode<synchronous>, transform_indices = @transform_2, window_bounds = array<i64: 27, 3, 32>}, {pipeline_mode = #tpu.pipeline_mode<synchronous>, transform_indices = @transform_3, window_bounds = array<i64: 1, 32>}, {pipeline_mode = #tpu.pipeline_mode<synchronous>, transform_indices = @transform_4, window_bounds = array<i64: 1, 32>}, {transform_indices = @transform_5, window_bounds = array<i64: 128, 32>}]} {
    %c0_i32 = arith.constant 0 : i32
    %0 = arith.cmpi eq, %arg1, %c0_i32 : i32
    %1 = arith.extui %0 : i1 to i32
    %c0_i32_0 = arith.constant 0 : i32
    %2 = arith.cmpi ne, %1, %c0_i32_0 : i32
    scf.if %2 {
      %cst_14 = arith.constant 0.000000e+00 : f32
      %27 = vector.broadcast %cst_14 : f32 to vector<128x32xf32>
      %c0_15 = arith.constant 0 : index
      %c0_16 = arith.constant 0 : index
      %28 = vector.load %arg9[%c0_15, %c0_16] : memref<128x32xf32, #tpu.memory_space<vmem>>, vector<128x32xf32>
      tpu.vector_store %arg9[%c0_15, %c0_16], %27 {strides = array<i32>} : memref<128x32xf32, #tpu.memory_space<vmem>>, vector<128x32xf32>,
    } else {
    }
    %c0 = arith.constant 0 : index
    %c0_1 = arith.constant 0 : index
    %3 = vector.load %arg3[%c0, %c0_1] : memref<128x1xi32, #tpu.memory_space<vmem>>, vector<128x1xi32>
    %4 = tpu.iota {dimensions = array<i32: 1>} : vector<128x256xi32>
    %5 = vector.broadcast %3 : vector<128x1xi32> to vector<128x256xi32>
    %6 = arith.cmpi eq, %5, %4 : vector<128x256xi32>
    %cst = arith.constant 1.000000e+00 : f32
    %cst_2 = arith.constant 0.000000e+00 : f32
    %7 = vector.broadcast %cst : f32 to vector<128x256xf32>
    %8 = vector.broadcast %cst_2 : f32 to vector<128x256xf32>
    %9 = arith.select %6, %7, %8 : vector<128x256xi1>, vector<128x256xf32>
    %10 = arith.truncf %9 : vector<128x256xf32> to vector<128x256xbf16>
    %c0_3 = arith.constant 0 : index
    %c0_4 = arith.constant 0 : index
    %11 = vector.load %arg4[%c0_3, %c0_4] : memref<256x3xbf16, #tpu.memory_space<vmem>>, vector<256x3xbf16>
    %cst_5 = arith.constant dense<0.000000e+00> : vector<128x3xf32>
    %12 = tpu.matmul %10, %11, %cst_5 {dimension_numbers = #tpu.dot_dimension_numbers<[1], [0], [0], [1], [0, 0, 1, 1], [], []>} : vector<128x256xbf16>, vector<256x3xbf16>, vector<128x3xf32> -> vector<128x3xf32>
    %13 = arith.truncf %12 : vector<128x3xf32> to vector<128x3xbf16>
    %14 = arith.index_cast %arg0 : i32 to index
    %15 = arith.index_cast %arg1 : i32 to index
    %16 = memref.load %arg2[%14, %15] : memref<2x27xi32, #tpu.memory_space<smem>>
    %17 = arith.index_cast %16 : i32 to index
    %c0_6 = arith.constant 0 : index
    %c0_7 = arith.constant 0 : index
    %18 = vector.load %arg5[%17, %c0_6, %c0_7] : memref<27x3x32xbf16, #tpu.memory_space<vmem>>, vector<1x3x32xbf16>
    %19 = vector.shape_cast %18 : vector<1x3x32xbf16> to vector<3x32xbf16>
    %c0_8 = arith.constant 0 : index
    %c0_9 = arith.constant 0 : index
    %20 = vector.load %arg9[%c0_8, %c0_9] : memref<128x32xf32, #tpu.memory_space<vmem>>, vector<128x32xf32>
    %cst_10 = arith.constant dense<0.000000e+00> : vector<128x32xf32>
    %21 = tpu.matmul %13, %19, %cst_10 {dimension_numbers = #tpu.dot_dimension_numbers<[1], [0], [0], [1], [0, 0, 1, 1], [], []>} : vector<128x3xbf16>, vector<3x32xbf16>, vector<128x32xf32> -> vector<128x32xf32>
    %22 = arith.addf %20, %21 : vector<128x32xf32>
    %c0_11 = arith.constant 0 : index
    %c0_12 = arith.constant 0 : index
    %23 = vector.load %arg9[%c0_11, %c0_12] : memref<128x32xf32, #tpu.memory_space<vmem>>, vector<128x32xf32>
    tpu.vector_store %arg9[%c0_11, %c0_12], %22 {strides = array<i32>} : memref<128x32xf32, #tpu.memory_space<vmem>>, vector<128x32xf32>,
    %c26_i32 = arith.constant 26 : i32
    %24 = arith.cmpi eq, %arg1, %c26_i32 : i32
    %25 = arith.extui %24 : i1 to i32
    %c0_i32_13 = arith.constant 0 : i32
    %26 = arith.cmpi ne, %25, %c0_i32_13 : i32
    scf.if %26 {
      %c0_14 = arith.constant 0 : index
      %c0_15 = arith.constant 0 : index
      %27 = vector.load %arg9[%c0_14, %c0_15] : memref<128x32xf32, #tpu.memory_space<vmem>>, vector<128x32xf32>
      %c0_16 = arith.constant 0 : index
      %c0_17 = arith.constant 0 : index
      %28 = vector.load %arg6[%c0_16, %c0_17] : memref<1x32xf32, #tpu.memory_space<vmem>>, vector<1x32xf32>
      %29 = vector.broadcast %28 : vector<1x32xf32> to vector<128x32xf32>
      %30 = arith.mulf %27, %29 : vector<128x32xf32>
      %c0_18 = arith.constant 0 : index
      %c0_19 = arith.constant 0 : index
      %31 = vector.load %arg7[%c0_18, %c0_19] : memref<1x32xf32, #tpu.memory_space<vmem>>, vector<1x32xf32>
      %32 = vector.broadcast %31 : vector<1x32xf32> to vector<128x32xf32>
      %33 = arith.addf %30, %32 : vector<128x32xf32>
      %34 = arith.truncf %33 : vector<128x32xf32> to vector<128x32xbf16>
      %c0_20 = arith.constant 0 : index
      %c0_21 = arith.constant 0 : index
      %35 = vector.load %arg8[%c0_20, %c0_21] : memref<128x32xbf16, #tpu.memory_space<vmem>>, vector<128x32xbf16>
      tpu.vector_store %arg8[%c0_20, %c0_21], %34 {strides = array<i32>} : memref<128x32xbf16, #tpu.memory_space<vmem>>, vector<128x32xbf16>,
    } else {
    }
    return
  }
  func.func @transform_0(%arg0: i32, %arg1: i32, %arg2: memref<2x27xi32, #tpu.memory_space<smem>>) -> (i32, i32) {
    %c2_i32 = arith.constant 2 : i32
    %0 = arith.muli %arg1, %c2_i32 : i32
    %1 = arith.addi %0, %arg0 : i32
    %c0_i32 = arith.constant 0 : i32
    %c0_i32_0 = arith.constant 0 : i32
    return %1, %c0_i32 : i32, i32
  }
  func.func @transform_1(%arg0: i32, %arg1: i32, %arg2: memref<2x27xi32, #tpu.memory_space<smem>>) -> (i32, i32) {
    %c0_i32 = arith.constant 0 : i32
    %c0_i32_0 = arith.constant 0 : i32
    %c0_i32_1 = arith.constant 0 : i32
    return %c0_i32, %c0_i32_0 : i32, i32
  }
  func.func @transform_2(%arg0: i32, %arg1: i32, %arg2: memref<2x27xi32, #tpu.memory_space<smem>>) -> (i32, i32, i32) {
    %c0_i32 = arith.constant 0 : i32
    %c0_i32_0 = arith.constant 0 : i32
    %c0_i32_1 = arith.constant 0 : i32
    %c0_i32_2 = arith.constant 0 : i32
    return %c0_i32, %c0_i32_0, %c0_i32_1 : i32, i32, i32
  }
  func.func @transform_3(%arg0: i32, %arg1: i32, %arg2: memref<2x27xi32, #tpu.memory_space<smem>>) -> (i32, i32) {
    %c0_i32 = arith.constant 0 : i32
    %c0_i32_0 = arith.constant 0 : i32
    %c0_i32_1 = arith.constant 0 : i32
    return %c0_i32, %c0_i32_0 : i32, i32
  }
  func.func @transform_4(%arg0: i32, %arg1: i32, %arg2: memref<2x27xi32, #tpu.memory_space<smem>>) -> (i32, i32) {
    %c0_i32 = arith.constant 0 : i32
    %c0_i32_0 = arith.constant 0 : i32
    %c0_i32_1 = arith.constant 0 : i32
    return %c0_i32, %c0_i32_0 : i32, i32
  }
  func.func @transform_5(%arg0: i32, %arg1: i32, %arg2: memref<2x27xi32, #tpu.memory_space<smem>>) -> (i32, i32) {
    %c0_i32 = arith.constant 0 : i32
    %c0_i32_0 = arith.constant 0 : i32
    return %arg0, %c0_i32 : i32, i32
  }
}

</mosaic_0001>

<bundles_post_ra>
// kernel: tpu_custom_call.1
= control target key start
LH: loop header
LB: loop body
LE: loop exit
PB: predicated region body
PF: predicated region fallthrough
CT: control target
= control target key end

     0   :  { %s1727_s0 = inlined_call_operand.vmem [shape: s32[2,27], index: 0, kind: input, shape index: {}]   ;;  %s1728_s1 = inlined_call_operand.vmem [shape: s32[6912,1], index: 1, kind: input, shape index: {}]   ;;  %s1729_s2 = inlined_call_operand.vmem [shape: bf16[256,3], index: 2, kind: input, shape index: {}]   ;;  %s1730_s3 = inlined_call_operand.vmem [shape: bf16[27,3,32], index: 3, kind: input, shape index: {}]   ;;  %s1731_s4 = inlined_call_operand.vmem [shape: f32[1,32], index: 4, kind: input, shape index: {}]   ;;  %s1732_s5 = inlined_call_operand.vmem [shape: f32[1,32], index: 5, kind: input, shape index: {}]   ;;  %s1733_s6 = inlined_call_operand.vmem [shape: bf16[256,32], index: 6, kind: output, shape index: {}]  }
   0x1   :  { %s11_s23 = sshll.u32 %s1727_s0, 4  ;;  %s12_s23 = int_to_ptr.vmem [resolvable:$true] %s11_s23 }
   0x2   :  { %s1347_s24 = scalar_lea.vmem %s12_s23, 32  ;;  %p1352_p1 = scmp.lt.s32.totalorder %s12_s23, %s12_s23 }
   0x3   :  { %p1348_p0 = scmp.ne.s32.totalorder %s12_s23, %s1347_s24  ;;  %p1353_p2 = scmp.lt.s32.totalorder %s1347_s24, %s1347_s24 }
   0x5   :  { %p1354_p3 = por %p1353_p2, %p1352_p1 }
   0x7   :  { %p1355_p4 = pnand %p1354_p3, %p1348_p0 }
   0x9   :  { %1358 = shalt.err (!%p1355_p4)  }
   0xa   :  { %s1401_s25 = smov [#allocation4]  }
   0xb   :  { %14 = dma.vmem_to_smem %s12_s23, 32, %s1401_s25, [#allocation3] }
   0xc   :  { %1379 = dma.done.wait [#allocation3], 32 }
   0xd   :  { %1380 = vsyncadd [#allocation3], 4294967264 }
   0xe   :  { %16 = sfence }
   0xf   :  { %s1444_s26 = smov 0   ;;  %s1446_s27 = smov 0  }
  0x10   :  { %s1448_s28 = smov 0   ;;  %s1450_s0 = smov 0  }
  0x11   :  { %s1452_s29 = smov 0  }
  0x12 LB: > { %s31_s30 = sadd.s32 1, %s1391_s28  ;;  %s34_s7 = sadd.s32 1, %s1395_s0  ;;  %s1399_s29 = sphi %s1452_s29, %s22_s29   ;;  %s1395_s0 = sphi %s1450_s0, %s1737_s0   ;;  %s1391_s28 = sphi %s1448_s28, %s1736_s28   ;;  %s1387_s27 = sphi %s1446_s27, %s1735_s27   ;;  %s1383_s26 = sphi %s1444_s26, %s1734_s26  }
  0x13   : > { %p32_p5 = scmp.ge.s32.totalorder %s31_s30, 27  ;;  %p1075_p6 = scmp.ge.s32.totalorder %s1399_s29, 1 }
  0x14   : > { %p215_p7 = scmp.lt.s32.totalorder %s1399_s29, 55 }
  0x15   : > { %s1739_s30 = smov (%p32_p5, %s31_s30), 0  ;;  %s1741_s7 = smov (!%p32_p5, %s34_s7), %s1395_s0 }
  0x16   : > { %p216_p8 = pnand %p1075_p6, %p215_p7  ;;  %p36_p9 = scmp.ge.s32.totalorder %s1741_s7, 2 }
  0x17   : > { %s1076_s8 = sshll.u32 (!%p216_p8), %s1383_s26, 1  ;;  %s1079_s9 = sshll.u32 (!%p216_p8), %s1387_s27, 4 }
  0x18   : > { %s1743_s7 = smov (%p36_p9, %s1741_s7), 0  ;;  %219 = sbr.rel (%p216_p8) target bundleno = 679 (0x2a7), region = 40 }
  0x19   : > { %s246_s10 = sadd.s32 (!%p216_p8), %s1387_s27, %s1076_s8  ;;  %p256_p10 = scmp.lt.s32.totalorder (!%p216_p8), %s1079_s9, 31 }
  0x1a   : > { %s1077_s11 = sshll.u32 (!%p216_p8), %s246_s10, 4  ;;  %p1081_p12 = scmp.ne.s32.totalorder (!%p216_p8), %s1383_s26, 0 }
  0x1b   : > { %p248_p11 = scmp.lt.s32.totalorder (!%p216_p8), %s1077_s11, 863 }
  0x1f   : > { %s1745_s9 = smov (!%p256_p10, %s1079_s9), 31  ;;  %s1747_s11 = smov (!%p248_p11, %s1077_s11), 863 }
  0x20   : > { %s1080_s12 = sshll.u32 %s1745_s9, 2  ;;  %s1078_s13 = sshll.u32 %s1747_s11, 3  ;;  %vm266_vm0 = vcmask (!%p1081_p12), 261120   ;;  %v1402_v0 = vmov (!%p1081_p12), 0.0  }
  0x21   : > { %s1484_s16 = scalar_lea.vmem %s1733_s6, %s1080_s12  ;;  %s1489_s19 = scalar_lea.vmem %s1728_s1, %s1078_s13  ;;  %267 = vst.msk [vmem:[#allocation2] sm:$0xff] (!%p1081_p12), %vm266_vm0, %v1402_v0  ;;  %268 = vst.msk [vmem:[#allocation2 + $0x8] sm:$0xff] (!%p1081_p12), %vm266_vm0, %v1402_v0 }
  0x22   : > { %265 = sbr.rel (%p1081_p12) target bundleno = 41 (0x29), region = 44  ;;  %269 = vst.msk [vmem:[#allocation2 + $0x10] sm:$0xff] (!%p1081_p12), %vm266_vm0, %v1402_v0  ;;  %270 = vst.msk [vmem:[#allocation2 + $0x18] sm:$0xff] (!%p1081_p12), %vm266_vm0, %v1402_v0 }
  0x23   : > { %271 = vst.msk [vmem:[#allocation2 + $0x20] sm:$0xff] (!%p1081_p12), %vm266_vm0, %v1402_v0  ;;  %272 = vst.msk [vmem:[#allocation2 + $0x28] sm:$0xff] (!%p1081_p12), %vm266_vm0, %v1402_v0 }
  0x24   : > { %273 = vst.msk [vmem:[#allocation2 + $0x30] sm:$0xff] (!%p1081_p12), %vm266_vm0, %v1402_v0  ;;  %274 = vst.msk [vmem:[#allocation2 + $0x38] sm:$0xff] (!%p1081_p12), %vm266_vm0, %v1402_v0 }
  0x25   : > { %275 = vst.msk [vmem:[#allocation2 + $0x40] sm:$0xff] (!%p1081_p12), %vm266_vm0, %v1402_v0  ;;  %276 = vst.msk [vmem:[#allocation2 + $0x48] sm:$0xff] (!%p1081_p12), %vm266_vm0, %v1402_v0 }
  0x26   : > { %277 = vst.msk [vmem:[#allocation2 + $0x50] sm:$0xff] (!%p1081_p12), %vm266_vm0, %v1402_v0  ;;  %278 = vst.msk [vmem:[#allocation2 + $0x58] sm:$0xff] (!%p1081_p12), %vm266_vm0, %v1402_v0 }
  0x27   : > { %279 = vst.msk [vmem:[#allocation2 + $0x60] sm:$0xff] (!%p1081_p12), %vm266_vm0, %v1402_v0  ;;  %280 = vst.msk [vmem:[#allocation2 + $0x68] sm:$0xff] (!%p1081_p12), %vm266_vm0, %v1402_v0 }
  0x28   : > { %281 = vst.msk [vmem:[#allocation2 + $0x70] sm:$0xff] (!%p1081_p12), %vm266_vm0, %v1402_v0  ;;  %282 = vst.msk [vmem:[#allocation2 + $0x78] sm:$0xff] (!%p1081_p12), %vm266_vm0, %v1402_v0 }
  0x29 PF: > { %v285_v1 = vld [vmem:[%s1489_s19 + $0x10] sm:$0xff]  ;;  %v283_v2 = vld [vmem:[%s1489_s19] sm:$0xff]  ;;  %v1403_v3 = vmov 0   ;;  %v286_v4 = vld [vmem:[%s1489_s19 + $0x18] sm:$0xff]  ;;  %v299_v34 = vlaneseq  ;;  %v1404_v43 = vmov 1.0|1.0  }
  0x2a   : > { %1330 = vset.pattern.permute.xlu1 %v1403_v3  ;;  %1329 = vset.pattern.permute.xlu0 %v1403_v3  ;;  %v284_v5 = vld [vmem:[%s1489_s19 + $0x8] sm:$0xff]  ;;  %v287_v7 = vld [vmem:[%s1489_s19 + $0x20] sm:$0xff]  ;;  %v290_v11 = vld [vmem:[%s1489_s19 + $0x38] sm:$0xff]  ;;  %s663_s18 = sshra.s32 %s1383_s26, 7  ;;  %s668_s22 = sand.u32 127, %s1383_s26  ;;  %v1405_v54 = vmov 65535  }
  0x2b   : > { %309 = vperm.xlu1 %1330, %v285_v1   ;;  %303 = vperm.xlu0 %1329, %v283_v2   ;;  %v288_v6 = vld [vmem:[%s1489_s19 + $0x28] sm:$0xff]  ;;  %v1331_v8 = vld [vmem:[%s1729_s2 + $0x40] sm:$0xff]   ;;  %v289_v13 = vld [vmem:[%s1489_s19 + $0x30] sm:$0xff]  ;;  %v1572_v35 = vand.u32 127, %v299_v34  ;;  %s665_s20 = sadd.s32 %s1387_s27, %s663_s18  ;;  %p1140_p13 = scmp.ne.s32.totalorder %s1383_s26, 26 }
  0x2c   : > { %v1332_v9 = vld [vmem:[%s1729_s2] sm:$0xff]   ;;  %1177 = vmatprep.subr.bf16.mxu0 %v1331_v8  ;;  %v1333_v10 = vld [vmem:[%s1729_s2 + $0x48] sm:$0xff]   ;;  %1268 = vmatprep.subr.bf16.mxu1 %v1331_v8  ;;  %v1335_v14 = vld [vmem:[%s1729_s2 + $0x50] sm:$0xff]   ;;  %s1130_s21 = sshll.u32 %s665_s20, 7 }
  0x2d   : > { %1178 = vmatpush3.bf16.msra.mxu0 %v1332_v9  ;;  %v1334_v12 = vld [vmem:[%s1729_s2 + $0x8] sm:$0xff]   ;;  %1276 = vmatpush3.bf16.msra.mxu1 %v1332_v9  ;;  %v1336_v16 = vld [vmem:[%s1729_s2 + $0x10] sm:$0xff]   ;;  %v291_v17 = vld [vmem:[%s1489_s19 + $0x40] sm:$0xff]  ;;  %v1575_v38 = vadd.s32 128, %v1572_v35  ;;  %s669_s23 = sadd.s32 %s1130_s21, %s668_s22 }
  0x2e   : > { %1179 = vmatprep.subr.bf16.mxu0 %v1333_v10  ;;  %1269 = vmatprep.subr.bf16.mxu1 %v1333_v10  ;;  %v292_v15 = vld [vmem:[%s1489_s19 + $0x48] sm:$0xff]  ;;  %v1337_v18 = vld [vmem:[%s1729_s2 + $0x58] sm:$0xff]   ;;  %v293_v21 = vld [vmem:[%s1489_s19 + $0x50] sm:$0xff]  ;;  %s670_s24 = sld [smem:[#allocation4 + %s669_s23]] }
  0x2f   : > { %312 = vperm.xlu1 %1330, %v286_v4   ;;  %306 = vperm.xlu0 %1329, %v284_v5   ;;  %v294_v19 = vld [vmem:[%s1489_s19 + $0x58] sm:$0xff]  ;;  %v1339_v22 = vld [vmem:[%s1729_s2 + $0x60] sm:$0xff]   ;;  %v296_v24 = vld [vmem:[%s1489_s19 + $0x68] sm:$0xff] }
  0x30   : > { %v1338_v20 = vld [vmem:[%s1729_s2 + $0x18] sm:$0xff]   ;;  %v1340_v23 = vld [vmem:[%s1729_s2 + $0x20] sm:$0xff]   ;;  %v1341_v26 = vld [vmem:[%s1729_s2 + $0x68] sm:$0xff]  }
  0x31   : > { %1180 = vmatpush3.bf16.msra.mxu0 %v1334_v12  ;;  %1277 = vmatpush3.bf16.msra.mxu1 %v1334_v12  ;;  %v295_v25 = vld [vmem:[%s1489_s19 + $0x60] sm:$0xff]  ;;  %v1342_v27 = vld [vmem:[%s1729_s2 + $0x28] sm:$0xff]   ;;  %v298_v28 = vld [vmem:[%s1489_s19 + $0x78] sm:$0xff] }
  0x32   : > { %1181 = vmatprep.subr.bf16.mxu0 %v1335_v14  ;;  %1270 = vmatprep.subr.bf16.mxu1 %v1335_v14  ;;  %v297_v29 = vld [vmem:[%s1489_s19 + $0x70] sm:$0xff]  ;;  %v1345_v32 = vld [vmem:[%s1729_s2 + $0x78] sm:$0xff]  }
  0x33   : > { %318 = vperm.xlu1 %1330, %v288_v6   ;;  %315 = vperm.xlu0 %1329, %v287_v7   ;;  %v1343_v30 = vld [vmem:[%s1729_s2 + $0x70] sm:$0xff]   ;;  %v1346_v33 = vld [vmem:[%s1729_s2 + $0x38] sm:$0xff]  }
  0x34   : > { %v1344_v31 = vld [vmem:[%s1729_s2 + $0x30] sm:$0xff]   ;;  %s1131_s25 = sshll.u32 %s670_s24, 1 }
  0x35   : > { %1182 = vmatpush3.bf16.msra.mxu0 %v1336_v16  ;;  %1278 = vmatpush3.bf16.msra.mxu1 %v1336_v16  ;;  %s672_s10 = scalar_lea.vmem %s1730_s3, %s1131_s25 }
  0x36   : > { %1183 = vmatprep.subr.bf16.mxu0 %v1337_v18  ;;  %1271 = vmatprep.subr.bf16.mxu1 %v1337_v18  ;;  %v673_v56 = vld [vmem:[%s672_s10] sm:$0x3] }
  0x37   : > { %324 = vperm.xlu1 %1330, %v290_v11   ;;  %321 = vperm.xlu0 %1329, %v289_v13  }
  0x39   : > { %1184 = vmatpush3.bf16.msra.mxu0 %v1338_v20  ;;  %1279 = vmatpush3.bf16.msra.mxu1 %v1338_v20 }
  0x3a   : > { %1185 = vmatprep.subr.bf16.mxu0 %v1339_v22  ;;  %1272 = vmatprep.subr.bf16.mxu1 %v1339_v22 }
  0x3b   : > { %330 = vperm.xlu1 %1330, %v292_v15   ;;  %327 = vperm.xlu0 %1329, %v291_v17  }
  0x3d   : > { %1186 = vmatpush3.bf16.msra.mxu0 %v1340_v23  ;;  %1280 = vmatpush3.bf16.msra.mxu1 %v1340_v23 }
  0x3e   : > { %1187 = vmatprep.subr.bf16.mxu0 %v1341_v26  ;;  %1273 = vmatprep.subr.bf16.mxu1 %v1341_v26 }
  0x3f   : > { %336 = vperm.xlu1 %1330, %v294_v19   ;;  %333 = vperm.xlu0 %1329, %v293_v21  }
  0x41   : > { %1188 = vmatpush3.bf16.msra.mxu0 %v1342_v27  ;;  %1281 = vmatpush3.bf16.msra.mxu1 %v1342_v27 }
  0x42   : > { %1189 = vmatprep.subr.bf16.mxu0 %v1343_v30  ;;  %1274 = vmatprep.subr.bf16.mxu1 %v1343_v30 }
  0x43   : > { %342 = vperm.xlu1 %1330, %v296_v24   ;;  %339 = vperm.xlu0 %1329, %v295_v25  }
  0x45   : > { %1190 = vmatpush3.bf16.msra.mxu0 %v1344_v31  ;;  %1282 = vmatpush3.bf16.msra.mxu1 %v1344_v31 }
  0x46   : > { %1191 = vmatprep.subr.bf16.mxu0 %v1345_v32  ;;  %1275 = vmatprep.subr.bf16.mxu1 %v1345_v32 }
  0x47   : > { %348 = vperm.xlu1 %1330, %v298_v28   ;;  %345 = vperm.xlu0 %1329, %v297_v29  }
  0x49   : > { %1192 = vmatpush3.bf16.msra.mxu0 %v1346_v33  ;;  %1283 = vmatpush3.bf16.msra.mxu1 %v1346_v33 }
  0xaa   : > { %v310_v36 = vpop.permute.xlu1 %309  ;;  %v304_v37 = vpop.permute.xlu0 %303 }
  0xab   : > { %vm355_vm1 = vcmp.eq.s32.totalorder %v310_v36, %v1575_v38  ;;  %vm350_vm5 = vcmp.eq.s32.totalorder %v304_v37, %v1572_v35  ;;  %vm351_vm8 = vcmp.eq.s32.totalorder %v304_v37, %v1575_v38  ;;  %vm354_vm10 = vcmp.eq.s32.totalorder %v310_v36, %v1572_v35 }
  0xae   : > { %v313_v39 = vpop.permute.xlu1 %312  ;;  %v307_v40 = vpop.permute.xlu0 %306 }
  0xaf   : > { %vm357_vm2 = vcmp.eq.s32.totalorder %v313_v39, %v1575_v38  ;;  %vm352_vm3 = vcmp.eq.s32.totalorder %v307_v40, %v1572_v35  ;;  %vm353_vm4 = vcmp.eq.s32.totalorder %v307_v40, %v1575_v38  ;;  %vm356_vm11 = vcmp.eq.s32.totalorder %v313_v39, %v1572_v35 }
  0xb0   : > { %vm1102_vm6 = vmpackc.low %vm357_vm2, %vm355_vm1 }
  0xb1   : > { %vm1100_vm7 = vmpackc.low %vm352_vm3, %vm350_vm5 }
  0xb2   : > { %v319_v41 = vpop.permute.xlu1 %318  ;;  %v316_v42 = vpop.permute.xlu0 %315  ;;  %vm1098_vm9 = vmpackc.low %vm353_vm4, %vm351_vm8 }
  0xb3   : > { %1099 = vmatprep.mubr.msk.bf16.mxu0 %vm1098_vm9, %v1404_v43  ;;  %vm361_vm12 = vcmp.eq.s32.totalorder %v319_v41, %v1575_v38  ;;  %vm359_vm13 = vcmp.eq.s32.totalorder %v316_v42, %v1575_v38  ;;  %vm1104_vm14 = vmpackc.low %vm356_vm11, %vm354_vm10  ;;  %vm360_vm0 = vcmp.eq.s32.totalorder %v319_v41, %v1572_v35  ;;  %vm358_vm1 = vcmp.eq.s32.totalorder %v316_v42, %v1572_v35 }
  0xb4   : > { %1101 = vmatmul.mubr.msk.bf16.vlgmr.msra.gmra.mrb[0].mxu0 %vm1100_vm7, %v1404_v43  ;;  %vm1106_vm15 = vmpackc.low %vm361_vm12, %vm359_vm13 }
  0xb5   : > { %1103 = vmatprep.mubr.msk.bf16.mxu0 %vm1102_vm6, %v1404_v43  ;;  %vm1108_vm4 = vmpackc.low %vm360_vm0, %vm358_vm1 }
  0xb6   : > { %v325_v44 = vpop.permute.xlu1 %324  ;;  %v322_v45 = vpop.permute.xlu0 %321 }
  0xb7   : > { %vm365_vm2 = vcmp.eq.s32.totalorder %v325_v44, %v1575_v38  ;;  %vm363_vm3 = vcmp.eq.s32.totalorder %v322_v45, %v1575_v38  ;;  %vm362_vm0 = vcmp.eq.s32.totalorder %v322_v45, %v1572_v35 }
  0xb8   : > { %vm1110_vm5 = vmpackc.low %vm365_vm2, %vm363_vm3 }
  0xba   : > { %v331_v46 = vpop.permute.xlu1 %330  ;;  %v328_v47 = vpop.permute.xlu0 %327 }
  0xbb   : > { %vm369_vm1 = vcmp.eq.s32.totalorder %v331_v46, %v1575_v38  ;;  %vm367_vm2 = vcmp.eq.s32.totalorder %v328_v47, %v1575_v38 }
  0xbc   : > { %1105 = vmatmul.mubr.msk.bf16.gmra.mrb[4].mxu0 %vm1104_vm14, %v1404_v43 }
  0xbd   : > { %1107 = vmatprep.mubr.msk.bf16.mxu0 %vm1106_vm15, %v1404_v43  ;;  %vm364_vm15 = vcmp.eq.s32.totalorder %v325_v44, %v1572_v35 }
  0xbe   : > { %v337_v48 = vpop.permute.xlu1 %336  ;;  %v334_v49 = vpop.permute.xlu0 %333 }
  0xc2   : > { %v343_v50 = vpop.permute.xlu1 %342  ;;  %v340_v51 = vpop.permute.xlu0 %339 }
  0xc3   : > { %vm376_vm6 = vcmp.eq.s32.totalorder %v343_v50, %v1572_v35  ;;  %vm374_vm7 = vcmp.eq.s32.totalorder %v340_v51, %v1572_v35  ;;  %vm375_vm8 = vcmp.eq.s32.totalorder %v340_v51, %v1575_v38  ;;  %vm377_vm9 = vcmp.eq.s32.totalorder %v343_v50, %v1575_v38  ;;  %v676_v51 = vld [vmem:[#allocation2 + $0x10] sm:$0xff] }
  0xc4   : > { %vm1124_vm10 = vmpackc.low %vm376_vm6, %vm374_vm7  ;;  %1109 = vmatmul.mubr.msk.bf16.gmra.mrb[8].mxu0 %vm1108_vm4, %v1404_v43 }
  0xc5   : > { %vm1122_vm11 = vmpackc.low %vm377_vm9, %vm375_vm8  ;;  %1111 = vmatprep.mubr.msk.bf16.mxu0 %vm1110_vm5, %v1404_v43  ;;  %vm368_vm8 = vcmp.eq.s32.totalorder %v331_v46, %v1572_v35  ;;  %vm366_vm9 = vcmp.eq.s32.totalorder %v328_v47, %v1572_v35 }
  0xc6   : > { %1123 = vmatprep.mubr.msk.bf16.mxu1 %vm1122_vm11, %v1404_v43  ;;  %v349_v52 = vpop.permute.xlu1 %348  ;;  %v346_v53 = vpop.permute.xlu0 %345  ;;  %vm1112_vm5 = vmpackc.low %vm364_vm15, %vm362_vm0  ;;  %vm371_vm11 = vcmp.eq.s32.totalorder %v334_v49, %v1575_v38  ;;  %vm370_vm15 = vcmp.eq.s32.totalorder %v334_v49, %v1572_v35 }
  0xc7   : > { %vm381_vm12 = vcmp.eq.s32.totalorder %v349_v52, %v1575_v38  ;;  %1125 = vmatmul.mubr.msk.bf16.vlgmr.msra.gmra.mrb[0].mxu1 %vm1124_vm10, %v1404_v43  ;;  %vm379_vm13 = vcmp.eq.s32.totalorder %v346_v53, %v1575_v38  ;;  %vm380_vm3 = vcmp.eq.s32.totalorder %v349_v52, %v1572_v35  ;;  %vm378_vm4 = vcmp.eq.s32.totalorder %v346_v53, %v1572_v35  ;;  %vm1114_vm6 = vmpackc.low %vm369_vm1, %vm367_vm2  ;;  %v674_v52 = vld [vmem:[#allocation2] sm:$0xff] }
  0xc8   : > { %vm1126_vm14 = vmpackc.low %vm381_vm12, %vm379_vm13  ;;  %vm373_vm10 = vcmp.eq.s32.totalorder %v337_v48, %v1575_v38  ;;  %vm715_vm1 = vcmask 1040384   ;;  %vm716_vm2 = vcmask 1041408  }
  0xc9   : > { %1127 = vmatprep.mubr.msk.bf16.mxu1 %vm1126_vm14, %v1404_v43  ;;  %vm1128_vm7 = vmpackc.low %vm380_vm3, %vm378_vm4  ;;  %vm372_vm14 = vcmp.eq.s32.totalorder %v337_v48, %v1572_v35  ;;  %v717_v55 = vsel %vm715_vm1, 4294967295, %v1405_v54  ;;  %vm690_vm3 = vcmask 23552   ;;  %vm835_vm4 = vcmask 261120   ;;  %v677_v54 = vld [vmem:[#allocation2 + $0x18] sm:$0xff] }
  0xca   : > { %vm1116_vm12 = vmpackc.low %vm368_vm8, %vm366_vm9  ;;  %v718_v57 = vsel %vm716_vm2, %v717_v55, 0 }
  0xcb   : > { %vm1118_vm13 = vmpackc.low %vm373_vm10, %vm371_vm11  ;;  %v720_v58 = vand.u32 %v718_v57, %v673_v56  ;;  %v675_v57 = vld [vmem:[#allocation2 + $0x8] sm:$0xff] }
  0xcc   : > { %1113 = vmatmul.mubr.msk.bf16.gmra.mrb[12].mxu0 %vm1112_vm5, %v1404_v43  ;;  %vm1120_vm0 = vmpackc.low %vm372_vm14, %vm370_vm15  ;;  %vm982_vm5 = vcmask (!%p1140_p13), 257024  }
  0xcd   : > { %1115 = vmatprep.mubr.msk.bf16.mxu0 %vm1114_vm6, %v1404_v43  ;;  %1250 = vmatprep.subr.bf16.mxu1 %v720_v58 }
  0xce   : > { %1251 = vmatpush3.bf16.msra.mxu1 %v720_v58 }
  0xcf   : > { %1129 = vmatmul.mubr.msk.bf16.gmra.mrb[4].mxu1 %vm1128_vm7, %v1404_v43 }
  0xd4   : > { %1117 = vmatmul.mubr.msk.bf16.gmra.mrb[16].mxu0 %vm1116_vm12, %v1404_v43 }
  0xd5   : > { %1119 = vmatprep.mubr.msk.bf16.mxu0 %vm1118_vm13, %v1404_v43 }
  0xdc   : > { %1121 = vmatmul.mubr.msk.bf16.gmra.mrb[20].mxu0 %vm1120_vm0, %v1404_v43 }
 0x187   : > { %v1193_v59 = vpop.f32.mrb[0].mxu0 }
 0x188   : > { %v1194_v60 = vpop.f32.mrb[1].mxu0 }
 0x189   : > { %v1195_v61 = vadd.f32 %v1194_v60, %v1193_v59  ;;  %v1196_v62 = vpop.f32.mrb[2].mxu0 }
 0x18a   : > { %v1197_v63 = vpop.f32.mrb[3].mxu0 }
 0x18b   : > { %v1198_v0 = vadd.f32 %v1197_v63, %v1196_v62  ;;  %v680_v63 = vld [vmem:[#allocation2 + $0x30] sm:$0xff] }
 0x18d   : > { %v655_v1 = vpack.c.bf16 %v1198_v0, %v1195_v61  ;;  %v678_v0 = vld [vmem:[#allocation2 + $0x20] sm:$0xff] }
 0x18f   : > { %v1199_v2 = vpop.f32.mrb[4].mxu0  ;;  %1252 = vmatprep.mubr.msk.bf16.mxu1 %vm690_vm3, %v655_v1 }
 0x190   : > { %v1200_v3 = vpop.f32.mrb[5].mxu0 }
 0x191   : > { %v1201_v4 = vadd.f32 %v1200_v3, %v1199_v2  ;;  %v1202_v5 = vpop.f32.mrb[6].mxu0  ;;  %v681_v2 = vld [vmem:[#allocation2 + $0x38] sm:$0xff] }
 0x192   : > { %v1203_v6 = vpop.f32.mrb[7].mxu0 }
 0x193   : > { %v1204_v7 = vadd.f32 %v1203_v6, %v1202_v5  ;;  %v679_v5 = vld [vmem:[#allocation2 + $0x28] sm:$0xff] }
 0x195   : > { %v656_v8 = vpack.c.bf16 %v1204_v7, %v1201_v4 }
 0x197   : > { %v1205_v9 = vpop.f32.mrb[8].mxu0  ;;  %1253 = vmatmul.mubr.msk.bf16.vlgmr.msra.gmra.mrb[8].mxu1 %vm690_vm3, %v656_v8 }
 0x198   : > { %v1206_v10 = vpop.f32.mrb[9].mxu0 }
 0x199   : > { %v1207_v11 = vadd.f32 %v1206_v10, %v1205_v9  ;;  %v1208_v12 = vpop.f32.mrb[10].mxu0 }
 0x19a   : > { %v1229_v13 = vpop.f32.mrb[0].mxu1  ;;  %v1209_v14 = vpop.f32.mrb[11].mxu0 }
 0x19b   : > { %v1230_v15 = vpop.f32.mrb[1].mxu1  ;;  %v1210_v16 = vadd.f32 %v1209_v14, %v1208_v12  ;;  %v682_v12 = vld [vmem:[#allocation2 + $0x40] sm:$0xff]  ;;  %v685_v14 = vld [vmem:[#allocation2 + $0x58] sm:$0xff] }
 0x19c   : > { %v1231_v17 = vadd.f32 %v1230_v15, %v1229_v13  ;;  %v1232_v18 = vpop.f32.mrb[2].mxu1 }
 0x19d   : > { %v1233_v19 = vpop.f32.mrb[3].mxu1  ;;  %v657_v20 = vpack.c.bf16 %v1210_v16, %v1207_v11  ;;  %v684_v11 = vld [vmem:[#allocation2 + $0x50] sm:$0xff] }
 0x19e   : > { %v1234_v21 = vadd.f32 %v1233_v19, %v1232_v18 }
 0x19f   : > { %v1211_v23 = vpop.f32.mrb[12].mxu0  ;;  %1256 = vmatprep.mubr.msk.bf16.mxu1 %vm690_vm3, %v657_v20 }
 0x1a0   : > { %v661_v22 = vpack.c.bf16 %v1234_v21, %v1231_v17  ;;  %v1212_v24 = vpop.f32.mrb[13].mxu0  ;;  %v683_v17 = vld [vmem:[#allocation2 + $0x48] sm:$0xff] }
 0x1a1   : > { %v1213_v25 = vadd.f32 %v1212_v24, %v1211_v23  ;;  %v1214_v26 = vpop.f32.mrb[14].mxu0  ;;  %v688_v23 = vld [vmem:[#allocation2 + $0x70] sm:$0xff]  ;;  %v686_v24 = vld [vmem:[#allocation2 + $0x60] sm:$0xff] }
 0x1a2   : > { %v1235_v27 = vpop.f32.mrb[4].mxu1  ;;  %v1215_v28 = vpop.f32.mrb[15].mxu0 }
 0x1a3   : > { %v1236_v29 = vpop.f32.mrb[5].mxu1  ;;  %v1216_v30 = vadd.f32 %v1215_v28, %v1214_v26  ;;  %v689_v26 = vld [vmem:[#allocation2 + $0x78] sm:$0xff] }
 0x1a4   : > { %v1237_v31 = vadd.f32 %v1236_v29, %v1235_v27  ;;  %v1238_v32 = vpop.f32.mrb[6].mxu1  ;;  %v687_v29 = vld [vmem:[#allocation2 + $0x68] sm:$0xff] }
 0x1a5   : > { %v1239_v33 = vpop.f32.mrb[7].mxu1  ;;  %v658_v34 = vpack.c.bf16 %v1216_v30, %v1213_v25 }
 0x1a6   : > { %v1240_v35 = vadd.f32 %v1239_v33, %v1238_v32 }
 0x1a7   : > { %v1217_v37 = vpop.f32.mrb[16].mxu0  ;;  %1257 = vmatmul.mubr.msk.bf16.gmra.mrb[12].mxu1 %vm690_vm3, %v658_v34 }
 0x1a8   : > { %v662_v36 = vpack.c.bf16 %v1240_v35, %v1237_v31  ;;  %v1218_v38 = vpop.f32.mrb[17].mxu0 }
 0x1a9   : > { %v1219_v39 = vadd.f32 %v1218_v38, %v1217_v37  ;;  %v1220_v40 = vpop.f32.mrb[18].mxu0  ;;  %v1662_v37 = vld [vmem:[%s1732_s5] ss:$0 sm:$0xff] (!%p1140_p13) }
 0x1aa   : > { %v1221_v41 = vpop.f32.mrb[19].mxu0 }
 0x1ab   : > { %v1222_v42 = vadd.f32 %v1221_v41, %v1220_v40 }
 0x1ad   : > { %v659_v43 = vpack.c.bf16 %v1222_v42, %v1219_v39 }
 0x1af   : > { %v1223_v44 = vpop.f32.mrb[20].mxu0  ;;  %1260 = vmatprep.mubr.msk.bf16.mxu1 %vm690_vm3, %v659_v43 }
 0x1b0   : > { %v1224_v45 = vpop.f32.mrb[21].mxu0 }
 0x1b1   : > { %v1225_v46 = vadd.f32 %v1224_v45, %v1223_v44  ;;  %v1226_v47 = vpop.f32.mrb[22].mxu0 }
 0x1b2   : > { %v1227_v48 = vpop.f32.mrb[23].mxu0 }
 0x1b3   : > { %v1228_v49 = vadd.f32 %v1227_v48, %v1226_v47 }
 0x1b5   : > { %v660_v50 = vpack.c.bf16 %v1228_v49, %v1225_v46 }
 0x1b7   : > { %1261 = vmatmul.mubr.msk.bf16.gmra.mrb[16].mxu1 %vm690_vm3, %v660_v50 }
 0x1b8   : > { %1264 = vmatprep.mubr.msk.bf16.mxu1 %vm690_vm3, %v661_v22 }
 0x1bf   : > { %1265 = vmatmul.mubr.msk.bf16.gmra.mrb[20].mxu1 %vm690_vm3, %v662_v36  ;;  %v1141_v36 = vld [vmem:[%s1731_s4] ss:$0 sm:$0xff] (!%p1140_p13) }
 0x26a   : > { %v1254_v53 = vpop.f32.mrb[8].mxu1 }
 0x26b   : > { %v821_v55 = vadd.f32 %v1254_v53, %v676_v51  ;;  %v756_v56 = vpop.f32.mrb[9].mxu1 }
 0x26c   : > { %v819_v58 = vadd.f32 %v756_v56, %v674_v52  ;;  %v1255_v59 = vpop.f32.mrb[10].mxu1 }
 0x26d   : > { %838 = vst.msk [vmem:[#allocation2 + $0x10] sm:$0xff] %vm835_vm4, %v821_v55  ;;  %v822_v60 = vadd.f32 %v1255_v59, %v677_v54  ;;  %v759_v61 = vpop.f32.mrb[11].mxu1 }
 0x26e   : > { %836 = vst.msk [vmem:[#allocation2] sm:$0xff] %vm835_vm4, %v819_v58  ;;  %v820_v62 = vadd.f32 %v759_v61, %v675_v57 }
 0x26f   : > { %839 = vst.msk [vmem:[#allocation2 + $0x18] sm:$0xff] %vm835_vm4, %v822_v60 }
 0x270   : > { %837 = vst.msk [vmem:[#allocation2 + $0x8] sm:$0xff] %vm835_vm4, %v820_v62 }
 0x274   : > { %v858_v40 = vld [vmem:[#allocation2 + $0x10] sm:$0xff] (!%p1140_p13) }
 0x275   : > { %v856_v35 = vld [vmem:[#allocation2] sm:$0xff] (!%p1140_p13)  ;;  %v881_v43 = vmul.f32 (!%p1140_p13), %v1141_v36, %v858_v40 }
 0x276   : > { %v879_v38 = vmul.f32 (!%p1140_p13), %v1141_v36, %v856_v35  ;;  %v859_v41 = vld [vmem:[#allocation2 + $0x18] sm:$0xff] (!%p1140_p13) }
 0x277   : > { %v857_v39 = vld [vmem:[#allocation2 + $0x8] sm:$0xff] (!%p1140_p13)  ;;  %v882_v44 = vmul.f32 (!%p1140_p13), %v1141_v36, %v859_v41  ;;  %v904_v54 = vadd.f32 (!%p1140_p13), %v1662_v37, %v881_v43 }
 0x278   : > { %v880_v42 = vmul.f32 (!%p1140_p13), %v1141_v36, %v857_v39  ;;  %v902_v48 = vadd.f32 (!%p1140_p13), %v1662_v37, %v879_v38 }
 0x279   : > { %v905_v55 = vadd.f32 (!%p1140_p13), %v1662_v37, %v882_v44 }
 0x27a   : > { %v1258_v1 = vpop.f32.mrb[12].mxu1  ;;  %v903_v53 = vadd.f32 (!%p1140_p13), %v1662_v37, %v880_v42  ;;  %v1161_v58 = vpack.c.bf16 (!%p1140_p13), %v902_v48, %v902_v48 }
 0x27b   : > { %v825_v3 = vadd.f32 %v1258_v1, %v680_v63  ;;  %v772_v4 = vpop.f32.mrb[13].mxu1 }
 0x27c   : > { %v823_v6 = vadd.f32 %v772_v4, %v678_v0  ;;  %v1259_v7 = vpop.f32.mrb[14].mxu1  ;;  %v1162_v1 = vpack.c.bf16 (!%p1140_p13), %v903_v53, %v903_v53  ;;  %983 = vst.msk [vmem:[%s1484_s16] sm:$0xf] (!%p1140_p13), %vm982_vm5, %v1161_v58 }
 0x27d   : > { %842 = vst.msk [vmem:[#allocation2 + $0x30] sm:$0xff] %vm835_vm4, %v825_v3  ;;  %v826_v8 = vadd.f32 %v1259_v7, %v681_v2  ;;  %v775_v9 = vpop.f32.mrb[15].mxu1  ;;  %v1163_v2 = vpack.c.bf16 (!%p1140_p13), %v904_v54, %v904_v54  ;;  %v1164_v3 = vpack.c.bf16 (!%p1140_p13), %v905_v55, %v905_v55 }
 0x27e   : > { %840 = vst.msk [vmem:[#allocation2 + $0x20] sm:$0xff] %vm835_vm4, %v823_v6  ;;  %v824_v10 = vadd.f32 %v775_v9, %v679_v5 }
 0x27f   : > { %843 = vst.msk [vmem:[#allocation2 + $0x38] sm:$0xff] %vm835_vm4, %v826_v8 }
 0x280   : > { %841 = vst.msk [vmem:[#allocation2 + $0x28] sm:$0xff] %vm835_vm4, %v824_v10 }
 0x281   : > { %984 = vst.msk [vmem:[%s1484_s16 + $0x4] sm:$0xf] (!%p1140_p13), %vm982_vm5, %v1162_v1  ;;  %985 = vst.msk [vmem:[%s1484_s16 + $0x8] sm:$0xf] (!%p1140_p13), %vm982_vm5, %v1163_v2 }
 0x282   : > { %986 = vst.msk [vmem:[%s1484_s16 + $0xc] sm:$0xf] (!%p1140_p13), %vm982_vm5, %v1164_v3 }
 0x284   : > { %v862_v47 = vld [vmem:[#allocation2 + $0x30] sm:$0xff] (!%p1140_p13) }
 0x285   : > { %v860_v45 = vld [vmem:[#allocation2 + $0x20] sm:$0xff] (!%p1140_p13)  ;;  %v885_v51 = vmul.f32 (!%p1140_p13), %v1141_v36, %v862_v47 }
 0x286   : > { %v883_v49 = vmul.f32 (!%p1140_p13), %v1141_v36, %v860_v45  ;;  %v863_v52 = vld [vmem:[#allocation2 + $0x38] sm:$0xff] (!%p1140_p13) }
 0x287   : > { %v861_v46 = vld [vmem:[#allocation2 + $0x28] sm:$0xff] (!%p1140_p13)  ;;  %v886_v56 = vmul.f32 (!%p1140_p13), %v1141_v36, %v863_v52  ;;  %v908_v61 = vadd.f32 (!%p1140_p13), %v1662_v37, %v885_v51 }
 0x288   : > { %v884_v50 = vmul.f32 (!%p1140_p13), %v1141_v36, %v861_v46  ;;  %v906_v59 = vadd.f32 (!%p1140_p13), %v1662_v37, %v883_v49 }
 0x289   : > { %v909_v4 = vadd.f32 (!%p1140_p13), %v1662_v37, %v886_v56  ;;  %v1167_v10 = vpack.c.bf16 (!%p1140_p13), %v908_v61, %v908_v61 }
 0x28a   : > { %v1262_v13 = vpop.f32.mrb[16].mxu1  ;;  %v907_v60 = vadd.f32 (!%p1140_p13), %v1662_v37, %v884_v50  ;;  %v1165_v8 = vpack.c.bf16 (!%p1140_p13), %v906_v59, %v906_v59 }
 0x28b   : > { %v829_v15 = vadd.f32 %v1262_v13, %v684_v11  ;;  %v788_v16 = vpop.f32.mrb[17].mxu1  ;;  %v1168_v13 = vpack.c.bf16 (!%p1140_p13), %v909_v4, %v909_v4  ;;  %989 = vst.msk [vmem:[%s1484_s16 + $0x18] sm:$0xf] (!%p1140_p13), %vm982_vm5, %v1167_v10 }
 0x28c   : > { %v827_v18 = vadd.f32 %v788_v16, %v682_v12  ;;  %v1263_v19 = vpop.f32.mrb[18].mxu1  ;;  %v1166_v9 = vpack.c.bf16 (!%p1140_p13), %v907_v60, %v907_v60  ;;  %987 = vst.msk [vmem:[%s1484_s16 + $0x10] sm:$0xf] (!%p1140_p13), %vm982_vm5, %v1165_v8 }
 0x28d   : > { %846 = vst.msk [vmem:[#allocation2 + $0x50] sm:$0xff] %vm835_vm4, %v829_v15  ;;  %v830_v20 = vadd.f32 %v1263_v19, %v685_v14  ;;  %v791_v21 = vpop.f32.mrb[19].mxu1 }
 0x28e   : > { %844 = vst.msk [vmem:[#allocation2 + $0x40] sm:$0xff] %vm835_vm4, %v827_v18  ;;  %v828_v22 = vadd.f32 %v791_v21, %v683_v17 }
 0x28f   : > { %847 = vst.msk [vmem:[#allocation2 + $0x58] sm:$0xff] %vm835_vm4, %v830_v20 }
 0x290   : > { %845 = vst.msk [vmem:[#allocation2 + $0x48] sm:$0xff] %vm835_vm4, %v828_v22 }
 0x291   : > { %988 = vst.msk [vmem:[%s1484_s16 + $0x14] sm:$0xf] (!%p1140_p13), %vm982_vm5, %v1166_v9  ;;  %990 = vst.msk [vmem:[%s1484_s16 + $0x1c] sm:$0xf] (!%p1140_p13), %vm982_vm5, %v1168_v13 }
 0x292   : > { %v1266_v25 = vpop.f32.mrb[20].mxu1  ;;  %855 = sbr.rel (%p1140_p13) target bundleno = 679 (0x2a7), region = 48 }
 0x293   : > { %v833_v27 = vadd.f32 %v1266_v25, %v688_v23  ;;  %v804_v28 = vpop.f32.mrb[21].mxu1 }
 0x294   : > { %v831_v30 = vadd.f32 %v804_v28, %v686_v24  ;;  %v1267_v31 = vpop.f32.mrb[22].mxu1  ;;  %v866_v63 = vld [vmem:[#allocation2 + $0x50] sm:$0xff] (!%p1140_p13) }
 0x295   : > { %850 = vst.msk [vmem:[#allocation2 + $0x70] sm:$0xff] %vm835_vm4, %v833_v27  ;;  %v834_v32 = vadd.f32 %v1267_v31, %v689_v26  ;;  %v807_v33 = vpop.f32.mrb[23].mxu1  ;;  %v864_v57 = vld [vmem:[#allocation2 + $0x40] sm:$0xff] (!%p1140_p13)  ;;  %v889_v15 = vmul.f32 (!%p1140_p13), %v1141_v36, %v866_v63 }
 0x296   : > { %848 = vst.msk [vmem:[#allocation2 + $0x60] sm:$0xff] %vm835_vm4, %v831_v30  ;;  %v832_v34 = vadd.f32 %v807_v33, %v687_v29  ;;  %v867_v0 = vld [vmem:[#allocation2 + $0x58] sm:$0xff] (!%p1140_p13)  ;;  %v887_v11 = vmul.f32 (!%p1140_p13), %v1141_v36, %v864_v57 }
 0x297   : > { %851 = vst.msk [vmem:[#allocation2 + $0x78] sm:$0xff] %vm835_vm4, %v834_v32  ;;  %v865_v62 = vld [vmem:[#allocation2 + $0x48] sm:$0xff] (!%p1140_p13)  ;;  %v890_v16 = vmul.f32 (!%p1140_p13), %v1141_v36, %v867_v0  ;;  %v912_v22 = vadd.f32 (!%p1140_p13), %v1662_v37, %v889_v15 }
 0x298   : > { %849 = vst.msk [vmem:[#allocation2 + $0x68] sm:$0xff] %vm835_vm4, %v832_v34  ;;  %v888_v14 = vmul.f32 (!%p1140_p13), %v1141_v36, %v865_v62  ;;  %v910_v17 = vadd.f32 (!%p1140_p13), %v1662_v37, %v887_v11 }
 0x299   : > { %v913_v23 = vadd.f32 %v1662_v37, %v890_v16  ;;  %v1171_v30 = vpack.c.bf16 %v912_v22, %v912_v22 }
 0x29a   : > { %v911_v21 = vadd.f32 %v1662_v37, %v888_v14  ;;  %v1169_v25 = vpack.c.bf16 %v910_v17, %v910_v17 }
 0x29b   : > { %v1172_v31 = vpack.c.bf16 %v913_v23, %v913_v23  ;;  %993 = vst.msk [vmem:[%s1484_s16 + $0x28] sm:$0xf] %vm982_vm5, %v1171_v30 }
 0x29c   : > { %v870_v7 = vld [vmem:[#allocation2 + $0x70] sm:$0xff]  ;;  %v1170_v29 = vpack.c.bf16 %v911_v21, %v911_v21  ;;  %991 = vst.msk [vmem:[%s1484_s16 + $0x20] sm:$0xf] %vm982_vm5, %v1169_v25 }
 0x29d   : > { %v868_v5 = vld [vmem:[#allocation2 + $0x60] sm:$0xff]  ;;  %v893_v20 = vmul.f32 %v1141_v36, %v870_v7  ;;  %994 = vst.msk [vmem:[%s1484_s16 + $0x2c] sm:$0xf] %vm982_vm5, %v1172_v31 }
 0x29e   : > { %v871_v12 = vld [vmem:[#allocation2 + $0x78] sm:$0xff]  ;;  %v891_v18 = vmul.f32 %v1141_v36, %v868_v5  ;;  %992 = vst.msk [vmem:[%s1484_s16 + $0x24] sm:$0xf] %vm982_vm5, %v1170_v29 }
 0x29f   : > { %v869_v6 = vld [vmem:[#allocation2 + $0x68] sm:$0xff]  ;;  %v894_v24 = vmul.f32 %v1141_v36, %v871_v12  ;;  %v916_v28 = vadd.f32 %v1662_v37, %v893_v20 }
 0x2a0   : > { %v892_v19 = vmul.f32 %v1141_v36, %v869_v6  ;;  %v914_v26 = vadd.f32 %v1662_v37, %v891_v18 }
 0x2a1   : > { %v917_v32 = vadd.f32 %v1662_v37, %v894_v24  ;;  %v1175_v35 = vpack.c.bf16 %v916_v28, %v916_v28 }
 0x2a2   : > { %v915_v27 = vadd.f32 %v1662_v37, %v892_v19  ;;  %v1173_v33 = vpack.c.bf16 %v914_v26, %v914_v26 }
 0x2a3   : > { %v1176_v36 = vpack.c.bf16 %v917_v32, %v917_v32  ;;  %997 = vst.msk [vmem:[%s1484_s16 + $0x38] sm:$0xf] %vm982_vm5, %v1175_v35 }
 0x2a4   : > { %v1174_v34 = vpack.c.bf16 %v915_v27, %v915_v27  ;;  %995 = vst.msk [vmem:[%s1484_s16 + $0x30] sm:$0xf] %vm982_vm5, %v1173_v33 }
 0x2a5   : > { %998 = vst.msk [vmem:[%s1484_s16 + $0x3c] sm:$0xf] %vm982_vm5, %v1176_v36 }
 0x2a6   : > { %996 = vst.msk [vmem:[%s1484_s16 + $0x34] sm:$0xf] %vm982_vm5, %v1174_v34 }
 0x2a7 PF: > { %s22_s29 = sadd.s32 1, %s1399_s29   ;;  %s1734_s26 = smov %s1391_s28 }
 0x2a8   : > { %p19_p0 = scmp.ge.s32.totalorder %s22_s29, 56   ;;  %s1735_s27 = smov %s1395_s0 }
 0x2a9   : > { %s1736_s28 = smov %s1739_s30  ;;  %s1737_s0 = smov %s1743_s7 }
 0x2aa   :  { %21 = sbr.rel (!%p19_p0) target bundleno = 18 (0x12), region = 79 }

</bundles_post_ra>
